<compile_context>
chip_gen: v5e
topology: v5e:2x2
jax: 0.10.0
libtpu: 0.0.40
codegen_flags: <defaults>
</compile_context>

<pallas_src>
import functools

import jax
import jax.numpy as jnp
from jax.experimental import pallas as pl
from jax.experimental.pallas import tpu as pltpu


def _ce_kernel(targets_ref, logits_ref, out_ref, m_ref, l_ref, t_ref, *,
               pad_id: int, vocab: int, tv: int, mask_cols: bool):
    """Grid = (batch, time_tiles, vocab_tiles); vocab axis is the reduction."""
    vi = pl.program_id(2)
    nv = pl.num_programs(2)

    @pl.when(vi == 0)
    def _():
        m_ref[...] = jnp.full(m_ref.shape, -jnp.inf, dtype=jnp.float32)
        l_ref[...] = jnp.zeros(l_ref.shape, dtype=jnp.float32)
        t_ref[...] = jnp.zeros(t_ref.shape, dtype=jnp.float32)

    x_src = logits_ref[0]                    # (TT, TV) in the source dtype
    tgt = targets_ref[0]                     # (TT, 1) int32 (resident across vi)

    # Global column index of each lane in this vocab chunk.
    col = tv * vi + jax.lax.broadcasted_iota(jnp.int32, (1, tv), 1)   # (1, TV)
    if mask_cols:
        # Ragged last vocab chunk: kill out-of-range columns (possibly NaN/Inf
        # garbage) before ANY reduction touches them.
        neg = jnp.asarray(-jnp.inf, dtype=x_src.dtype)
        x_src = jnp.where(col < vocab, x_src, neg)

    # Chunk max in the source dtype (exact ordering for bf16), then one upcast
    # that is reused by both the exp-sum and the target gather.
    m_prev = m_ref[...]                                               # (TT, 1)
    m_new = jnp.maximum(
        m_prev, jnp.max(x_src, axis=-1, keepdims=True).astype(jnp.float32))
    x = x_src.astype(jnp.float32)                                     # (TT, TV)

    alpha = jnp.exp(m_prev - m_new)                                   # (TT, 1)
    p = jnp.exp(x - m_new)                                            # (TT, TV)
    l_ref[...] = alpha * l_ref[...] + jnp.sum(p, axis=-1, keepdims=True)

    # Gather logits[row, target[row]] via lane-iota compare (no dynamic gather
    # on TPU).  Out-of-range target ids contribute garbage instead of raising
    # like PyTorch (documented divergence).
    t_ref[...] = t_ref[...] + jnp.sum(jnp.where(col == tgt, x, 0.0),
                                      axis=-1, keepdims=True)
    m_ref[...] = m_new

    @pl.when(vi == nv - 1)
    def _():
        lse = m_ref[...] + jnp.log(l_ref[...])                        # (TT, 1)
        # ignore_index mask; also masks the padded/ragged time tail (those rows
        # carry pad_id), so any garbage in out-of-bounds rows of the last time
        # tile (including NaN/Inf) is dropped here -- all reductions above are
        # per-row keepdims, so garbage stays row-confined.
        valid = tgt != pad_id
        per_row = jnp.where(valid, lse - t_ref[...], 0.0)
        loss_sum = jnp.sum(per_row)
        cnt = jnp.sum(valid.astype(jnp.float32))
        # Pack (sum, count) into one lane-aligned (8, 128) block:
        # sublane 0 = loss_sum, sublane 1 = valid_count.
        sub = jax.lax.broadcasted_iota(jnp.int32, (8, 128), 0)
        packed = jnp.where(sub == 0, loss_sum, jnp.where(sub == 1, cnt, 0.0))
        out_ref[...] = packed.reshape(out_ref.shape)


def _round_up(x: int, m: int) -> int:
    return ((x + m - 1) // m) * m


def _vmem_capacity_bytes() -> int:
    try:
        return int(pltpu.get_tpu_info().vmem_capacity_bytes)
    except Exception:
        pass
    try:
        kind = jax.devices()[0].device_kind.lower()
    except Exception:
        kind = ""
    if "v7" in kind:
        return 64 * 1024 * 1024
    # v5e / v6e (and v4) are 128 MiB parts; don't pessimize them.
    return 128 * 1024 * 1024


def _pick_tiles(T: int, V: int, in_bytes: int, vmem_cap: int):
    """Pick (time_tile, vocab_tile)."""
    # Vocab tile: full vocab when small; otherwise 2048-wide chunks (a multiple
    # of 128, legal even when it does not divide V -- the ragged last chunk is
    # masked in-kernel).  Chunking keeps f32 temporaries O(TT * TV).
    tv = V if V <= 4096 else 2048

    # Row tile: budget ~3/8 of physical VMEM against the real footprint:
    # double-buffered (TT, TV) input block + ~3 live f32 (TT, TV) temporaries
    # + lane-padded targets/scratch/output slack.
    budget = (vmem_cap * 3) // 8
    per_row = 2 * tv * in_bytes + 3 * tv * 4 + 4096
    tt = budget // max(per_row, 1)
    tt = max(8, (int(tt) // 8) * 8)
    # No hard 1024 cap: small-V tiles grow until the block is MiB-scale so the
    # ~0.35us grid-step overhead is amortized; the 8192 ceiling only bounds
    # compile / unroll cost.
    tt = min(tt, 8192, _round_up(max(T, 1), 8))
    return tt, tv


def cross_entropy_loss(logits, targets, *, pad_id: int = 0, reduction: str = "mean",
                       time_tile: int | None = None, vocab_tile: int | None = None):
    """Matches CrossEntropyLoss.forward(logits[B, T_l, V], targets[B, T_t]).

    Prefer bf16 logits where possible (kernel upcasts internally; reductions and
    exp stay in f32) -- halves HBM ingress for this HBM-bound kernel.
    """
    if reduction not in ("mean", "sum"):
        # TODO(synk): reduction='none' (per-element loss tensor) not implemented.
        raise NotImplementedError(f"reduction={reduction!r} not supported")

    B, T_l, V = logits.shape
    T = min(T_l, int(targets.shape[1]))

    vmem_cap = _vmem_capacity_bytes()
    tt, tv = _pick_tiles(T, V, logits.dtype.itemsize, vmem_cap)
    if time_tile is not None:
        tt = time_tile
    if vocab_tile is not None:
        tv = vocab_tile

    n_t = pl.cdiv(T, tt)
    n_v = pl.cdiv(V, tv)
    mask_cols = (V % tv) != 0

    # Logits are NOT sliced / reshaped on the host (that would add a full extra
    # HBM read+write pass); the grid only covers t < T.  Only the tiny targets
    # tensor is trimmed and padded with pad_id so the ragged time tail (and any
    # rows beyond T) are masked inside the kernel.
    T_pad = n_t * tt
    tgt = targets[:, :T].astype(jnp.int32)
    if T_pad != T:
        tgt = jnp.pad(tgt, ((0, 0), (0, T_pad - T)), constant_values=pad_id)
    tgt = tgt.reshape(B, T_pad, 1)

    kernel = functools.partial(_ce_kernel, pad_id=pad_id, vocab=V, tv=tv,
                               mask_cols=mask_cols)

    parts = pl.pallas_call(
        kernel,
        out_shape=jax.ShapeDtypeStruct((B, n_t, 8, 128), jnp.float32),
        grid_spec=pltpu.PrefetchScalarGridSpec(
            num_scalar_prefetch=0,
            grid=(B, n_t, n_v),
            in_specs=[
                # targets: resident across the vocab axis
                pl.BlockSpec((1, tt, 1), lambda b, ti, vi: (b, ti, 0)),
                # logits: streamed per vocab chunk; time trim via grid extent
                pl.BlockSpec((1, tt, tv), lambda b, ti, vi: (b, ti, vi)),
            ],
            out_specs=pl.BlockSpec((1, 1, 8, 128), lambda b, ti, vi: (b, ti, 0, 0)),
            scratch_shapes=[pltpu.VMEM((tt, 1), jnp.float32)] * 3,   # m, l, tgt_logit
        ),
        compiler_params=pltpu.CompilerParams(
            # batch & time tiles are independent -> parallel (megacore on v7x);
            # vocab axis is the online-logsumexp reduction -> arbitrary (last).
            dimension_semantics=("parallel", "parallel", "arbitrary"),
            vmem_limit_bytes=int(max(vmem_cap - (8 << 20), 32 << 20)),
        ),
    )(tgt, logits)

    total = jnp.sum(parts[:, :, 0, 0])
    count = jnp.sum(parts[:, :, 1, 0])
    if reduction == "mean":
        # NaN when every target == pad_id, matching PyTorch behavior.
        return total / count
    return total


def _reference(logits, targets, pad_id=0, reduction="mean"):
    """Pure-JAX reference of nn.CrossEntropyLoss(reduction=..., ignore_index=pad_id)."""
    B, T_l, V = logits.shape
    T = min(T_l, targets.shape[1])
    lg = logits[:, :T, :].reshape(-1, V).astype(jnp.float32)
    tg = targets[:, :T].reshape(-1)
    lse = jax.nn.logsumexp(lg, axis=-1)
    tgt_logit = jnp.take_along_axis(lg, tg[:, None], axis=-1)[:, 0]
    per = lse - tgt_logit
    valid = tg != pad_id
    total = jnp.sum(jnp.where(valid, per, 0.0))
    if reduction == "mean":
        return total / jnp.sum(valid)
    return total


if __name__ == "__main__":
    key = jax.random.PRNGKey(0)
    k1, k2, k3, k4 = jax.random.split(key, 4)
    PAD_ID = 0

    # --- case 1: T_logits > T_targets, single vocab chunk -------------------
    B, T_logits, T_targets, V = 2, 10, 8, 32
    logits = jax.random.normal(k1, (B, T_logits, V), dtype=jnp.float32)
    targets = jax.random.randint(k2, (B, T_targets), 1, V, dtype=jnp.int32)
    targets = targets.at[0, -2:].set(PAD_ID)
    targets = targets.at[1, -1:].set(PAD_ID)

    loss = cross_entropy_loss(logits, targets, pad_id=PAD_ID, reduction="mean")
    loss = jax.block_until_ready(loss)
    ref = _reference(logits, targets, pad_id=PAD_ID, reduction="mean")
    assert jnp.allclose(loss, ref, rtol=1e-5, atol=1e-5), (loss, ref)

    loss_s = cross_entropy_loss(logits, targets, pad_id=PAD_ID, reduction="sum")
    loss_s = jax.block_until_ready(loss_s)
    ref_s = _reference(logits, targets, pad_id=PAD_ID, reduction="sum")
    assert jnp.allclose(loss_s, ref_s, rtol=1e-5, atol=1e-5), (loss_s, ref_s)

    # --- case 2: T_targets > T_logits, chunked vocab + ragged masks ---------
    B2, T_logits2, T_targets2, V2 = 2, 7, 9, 640
    logits2 = jax.random.normal(k3, (B2, T_logits2, V2), dtype=jnp.float32)
    targets2 = jax.random.randint(k4, (B2, T_targets2), 1, V2, dtype=jnp.int32)
    targets2 = targets2.at[0, 3].set(PAD_ID)

    loss2 = cross_entropy_loss(logits2, targets2, pad_id=PAD_ID, reduction="mean",
                               time_tile=8, vocab_tile=256)   # exercises online LSE + col mask
    loss2 = jax.block_until_ready(loss2)
    ref2 = _reference(logits2, targets2, pad_id=PAD_ID, reduction="mean")
    assert jnp.allclose(loss2, ref2, rtol=1e-5, atol=1e-5), (loss2, ref2)

    print("KERNEL_OK")
</pallas_src>

<mosaic_0001>
module attributes {stable_mosaic.version = 11 : i64} {
  func.func @_ce_kernel(%arg0: i32, %arg1: i32, %arg2: i32, %arg3: memref<1x8x1xi32, #tpu.memory_space<vmem>>, %arg4: memref<1x8x32xf32, #tpu.memory_space<vmem>>, %arg5: memref<1x1x8x128xf32, #tpu.memory_space<vmem>>, %arg6: memref<8x1xf32, #tpu.memory_space<vmem>>, %arg7: memref<8x1xf32, #tpu.memory_space<vmem>>, %arg8: memref<8x1xf32, #tpu.memory_space<vmem>>) attributes {dimension_semantics = [#tpu.dimension_semantics<parallel>, #tpu.dimension_semantics<parallel>, #tpu.dimension_semantics<arbitrary>], iteration_bounds = array<i64: 2, 1, 1>, scalar_prefetch = 0 : i64, scratch_operands = 3 : i64, tpu.core_type = #tpu.core_type<tc>, window_params = [{transform_indices = @transform_0, window_bounds = array<i64: 1, 8, 1>}, {transform_indices = @transform_1, window_bounds = array<i64: 1, 8, 32>}, {transform_indices = @transform_2, window_bounds = array<i64: 1, 1, 8, 128>}]} {
    %c0_i32 = arith.constant 0 : i32
    %0 = arith.cmpi eq, %arg2, %c0_i32 : i32
    %1 = arith.extui %0 : i1 to i32
    %c0_i32_0 = arith.constant 0 : i32
    %2 = arith.cmpi ne, %1, %c0_i32_0 : i32
    scf.if %2 {
      %cst_23 = arith.constant 0xFF800000 : f32
      %40 = vector.broadcast %cst_23 : f32 to vector<8x1xf32>
      %c0_24 = arith.constant 0 : index
      %c0_25 = arith.constant 0 : index
      %41 = vector.load %arg6[%c0_24, %c0_25] : memref<8x1xf32, #tpu.memory_space<vmem>>, vector<8x1xf32>
      tpu.vector_store %arg6[%c0_24, %c0_25], %40 {strides = array<i32>} : memref<8x1xf32, #tpu.memory_space<vmem>>, vector<8x1xf32>,
      %cst_26 = arith.constant 0.000000e+00 : f32
      %42 = vector.broadcast %cst_26 : f32 to vector<8x1xf32>
      %c0_27 = arith.constant 0 : index
      %c0_28 = arith.constant 0 : index
      %43 = vector.load %arg7[%c0_27, %c0_28] : memref<8x1xf32, #tpu.memory_space<vmem>>, vector<8x1xf32>
      tpu.vector_store %arg7[%c0_27, %c0_28], %42 {strides = array<i32>} : memref<8x1xf32, #tpu.memory_space<vmem>>, vector<8x1xf32>,
      %cst_29 = arith.constant 0.000000e+00 : f32
      %44 = vector.broadcast %cst_29 : f32 to vector<8x1xf32>
      %c0_30 = arith.constant 0 : index
      %c0_31 = arith.constant 0 : index
      %45 = vector.load %arg8[%c0_30, %c0_31] : memref<8x1xf32, #tpu.memory_space<vmem>>, vector<8x1xf32>
      tpu.vector_store %arg8[%c0_30, %c0_31], %44 {strides = array<i32>} : memref<8x1xf32, #tpu.memory_space<vmem>>, vector<8x1xf32>,
    } else {
    }
    %c0 = arith.constant 0 : index
    %c0_1 = arith.constant 0 : index
    %c0_2 = arith.constant 0 : index
    %3 = vector.load %arg4[%c0, %c0_1, %c0_2] : memref<1x8x32xf32, #tpu.memory_space<vmem>>, vector<1x8x32xf32>
    %4 = vector.shape_cast %3 : vector<1x8x32xf32> to vector<8x32xf32>
    %c0_3 = arith.constant 0 : index
    %c0_4 = arith.constant 0 : index
    %c0_5 = arith.constant 0 : index
    %5 = vector.load %arg3[%c0_3, %c0_4, %c0_5] : memref<1x8x1xi32, #tpu.memory_space<vmem>>, vector<1x8x1xi32>
    %6 = vector.shape_cast %5 : vector<1x8x1xi32> to vector<8x1xi32>
    %c32_i32 = arith.constant 32 : i32
    %7 = arith.muli %c32_i32, %arg2 : i32
    %8 = tpu.iota {dimensions = array<i32: 1>} : vector<1x32xi32>
    %9 = vector.broadcast %7 : i32 to vector<1x32xi32>
    %10 = arith.addi %9, %8 : vector<1x32xi32>
    %c0_6 = arith.constant 0 : index
    %c0_7 = arith.constant 0 : index
    %11 = vector.load %arg6[%c0_6, %c0_7] : memref<8x1xf32, #tpu.memory_space<vmem>>, vector<8x1xf32>
    %cst = arith.constant dense<0xFF800000> : vector<8xf32>
    %12 = vector.multi_reduction <maximumf>, %4, %cst [1] : vector<8x32xf32> to vector<8xf32>
    %13 = vector.shape_cast %12 : vector<8xf32> to vector<8x1xf32>
    %14 = arith.maximumf %11, %13 : vector<8x1xf32>
    %15 = arith.subf %11, %14 : vector<8x1xf32>
    %16 = math.exp %15 : vector<8x1xf32>
    %17 = vector.broadcast %14 : vector<8x1xf32> to vector<8x32xf32>
    %18 = arith.subf %4, %17 : vector<8x32xf32>
    %19 = math.exp %18 : vector<8x32xf32>
    %c0_8 = arith.constant 0 : index
    %c0_9 = arith.constant 0 : index
    %20 = vector.load %arg7[%c0_8, %c0_9] : memref<8x1xf32, #tpu.memory_space<vmem>>, vector<8x1xf32>
    %21 = arith.mulf %16, %20 : vector<8x1xf32>
    %cst_10 = arith.constant dense<0.000000e+00> : vector<8xf32>
    %22 = vector.multi_reduction <add>, %19, %cst_10 [1] : vector<8x32xf32> to vector<8xf32>
    %23 = vector.shape_cast %22 : vector<8xf32> to vector<8x1xf32>
    %24 = arith.addf %21, %23 : vector<8x1xf32>
    %c0_11 = arith.constant 0 : index
    %c0_12 = arith.constant 0 : index
    %25 = vector.load %arg7[%c0_11, %c0_12] : memref<8x1xf32, #tpu.memory_space<vmem>>, vector<8x1xf32>
    tpu.vector_store %arg7[%c0_11, %c0_12], %24 {strides = array<i32>} : memref<8x1xf32, #tpu.memory_space<vmem>>, vector<8x1xf32>,
    %c0_13 = arith.constant 0 : index
    %c0_14 = arith.constant 0 : index
    %26 = vector.load %arg8[%c0_13, %c0_14] : memref<8x1xf32, #tpu.memory_space<vmem>>, vector<8x1xf32>
    %27 = vector.broadcast %10 : vector<1x32xi32> to vector<8x32xi32>
    %28 = vector.broadcast %6 : vector<8x1xi32> to vector<8x32xi32>
    %29 = arith.cmpi eq, %27, %28 : vector<8x32xi32>
    %cst_15 = arith.constant 0.000000e+00 : f32
    %30 = vector.broadcast %cst_15 : f32 to vector<8x32xf32>
    %31 = arith.select %29, %4, %30 : vector<8x32xi1>, vector<8x32xf32>
    %cst_16 = arith.constant dense<0.000000e+00> : vector<8xf32>
    %32 = vector.multi_reduction <add>, %31, %cst_16 [1] : vector<8x32xf32> to vector<8xf32>
    %33 = vector.shape_cast %32 : vector<8xf32> to vector<8x1xf32>
    %34 = arith.addf %26, %33 : vector<8x1xf32>
    %c0_17 = arith.constant 0 : index
    %c0_18 = arith.constant 0 : index
    %35 = vector.load %arg8[%c0_17, %c0_18] : memref<8x1xf32, #tpu.memory_space<vmem>>, vector<8x1xf32>
    tpu.vector_store %arg8[%c0_17, %c0_18], %34 {strides = array<i32>} : memref<8x1xf32, #tpu.memory_space<vmem>>, vector<8x1xf32>,
    %c0_19 = arith.constant 0 : index
    %c0_20 = arith.constant 0 : index
    %36 = vector.load %arg6[%c0_19, %c0_20] : memref<8x1xf32, #tpu.memory_space<vmem>>, vector<8x1xf32>
    tpu.vector_store %arg6[%c0_19, %c0_20], %14 {strides = array<i32>} : memref<8x1xf32, #tpu.memory_space<vmem>>, vector<8x1xf32>,
    %c0_i32_21 = arith.constant 0 : i32
    %37 = arith.cmpi eq, %arg2, %c0_i32_21 : i32
    %38 = arith.extui %37 : i1 to i32
    %c0_i32_22 = arith.constant 0 : i32
    %39 = arith.cmpi ne, %38, %c0_i32_22 : i32
    scf.if %39 {
      %c0_23 = arith.constant 0 : index
      %c0_24 = arith.constant 0 : index
      %40 = vector.load %arg6[%c0_23, %c0_24] : memref<8x1xf32, #tpu.memory_space<vmem>>, vector<8x1xf32>
      %c0_25 = arith.constant 0 : index
      %c0_26 = arith.constant 0 : index
      %41 = vector.load %arg7[%c0_25, %c0_26] : memref<8x1xf32, #tpu.memory_space<vmem>>, vector<8x1xf32>
      %42 = math.log %41 : vector<8x1xf32>
      %43 = arith.addf %40, %42 : vector<8x1xf32>
      %c0_i32_27 = arith.constant 0 : i32
      %44 = vector.broadcast %c0_i32_27 : i32 to vector<8x1xi32>
      %45 = arith.cmpi ne, %6, %44 : vector<8x1xi32>
      %c0_28 = arith.constant 0 : index
      %c0_29 = arith.constant 0 : index
      %46 = vector.load %arg8[%c0_28, %c0_29] : memref<8x1xf32, #tpu.memory_space<vmem>>, vector<8x1xf32>
      %47 = arith.subf %43, %46 : vector<8x1xf32>
      %cst_30 = arith.constant 0.000000e+00 : f32
      %48 = vector.broadcast %cst_30 : f32 to vector<8x1xf32>
      %49 = arith.select %45, %47, %48 : vector<8x1xi1>, vector<8x1xf32>
      %50 = vector.shape_cast %49 : vector<8x1xf32> to vector<1x8x1xf32>
      %cst_31 = arith.constant dense<0.000000e+00> : vector<1xf32>
      %51 = vector.multi_reduction <add>, %50, %cst_31 [1, 2] : vector<1x8x1xf32> to vector<1xf32>
      %52 = vector.shape_cast %51 : vector<1xf32> to vector<1x1x1xf32>
      %53 = vector.extract %52[0, 0, 0] : f32 from vector<1x1x1xf32>
      %54 = arith.extui %45 : vector<8x1xi1> to vector<8x1xi32>
      %55 = arith.sitofp %54 : vector<8x1xi32> to vector<8x1xf32>
      %56 = vector.shape_cast %55 : vector<8x1xf32> to vector<1x8x1xf32>
      %cst_32 = arith.constant dense<0.000000e+00> : vector<1xf32>
      %57 = vector.multi_reduction <add>, %56, %cst_32 [1, 2] : vector<1x8x1xf32> to vector<1xf32>
      %58 = vector.shape_cast %57 : vector<1xf32> to vector<1x1x1xf32>
      %59 = vector.extract %58[0, 0, 0] : f32 from vector<1x1x1xf32>
      %60 = tpu.iota {dimensions = array<i32: 0>} : vector<8x128xi32>
      %c0_i32_33 = arith.constant 0 : i32
      %61 = vector.broadcast %c0_i32_33 : i32 to vector<8x128xi32>
      %62 = arith.cmpi eq, %60, %61 : vector<8x128xi32>
      %c1_i32 = arith.constant 1 : i32
      %63 = vector.broadcast %c1_i32 : i32 to vector<8x128xi32>
      %64 = arith.cmpi eq, %60, %63 : vector<8x128xi32>
      %cst_34 = arith.constant 0.000000e+00 : f32
      %65 = vector.broadcast %59 : f32 to vector<8x128xf32>
      %66 = vector.broadcast %cst_34 : f32 to vector<8x128xf32>
      %67 = arith.select %64, %65, %66 : vector<8x128xi1>, vector<8x128xf32>
      %68 = vector.broadcast %53 : f32 to vector<8x128xf32>
      %69 = arith.select %62, %68, %67 : vector<8x128xi1>, vector<8x128xf32>
      %70 = vector.shape_cast %69 : vector<8x128xf32> to vector<1x1x8x128xf32>
      %c0_35 = arith.constant 0 : index
      %c0_36 = arith.constant 0 : index
      %c0_37 = arith.constant 0 : index
      %c0_38 = arith.constant 0 : index
      %71 = vector.load %arg5[%c0_35, %c0_36, %c0_37, %c0_38] : memref<1x1x8x128xf32, #tpu.memory_space<vmem>>, vector<1x1x8x128xf32>
      tpu.vector_store %arg5[%c0_35, %c0_36, %c0_37, %c0_38], %70 {strides = array<i32>} : memref<1x1x8x128xf32, #tpu.memory_space<vmem>>, vector<1x1x8x128xf32>,
    } else {
    }
    return
  }
  func.func @transform_0(%arg0: i32, %arg1: i32, %arg2: i32) -> (i32, i32, i32) {
    %c0_i32 = arith.constant 0 : i32
    %c0_i32_0 = arith.constant 0 : i32
    return %arg0, %arg1, %c0_i32 : i32, i32, i32
  }
  func.func @transform_1(%arg0: i32, %arg1: i32, %arg2: i32) -> (i32, i32, i32) {
    %c0_i32 = arith.constant 0 : i32
    return %arg0, %arg1, %arg2 : i32, i32, i32
  }
  func.func @transform_2(%arg0: i32, %arg1: i32, %arg2: i32) -> (i32, i32, i32, i32) {
    %c0_i32 = arith.constant 0 : i32
    %c0_i32_0 = arith.constant 0 : i32
    %c0_i32_1 = arith.constant 0 : i32
    return %arg0, %arg1, %c0_i32, %c0_i32_0 : i32, i32, i32, i32
  }
}

</mosaic_0001>

<bundles_post_ra>
// kernel: tpu_custom_call.1
= control target key start
LH: loop header
LB: loop body
LE: loop exit
PB: predicated region body
PF: predicated region fallthrough
CT: control target
= control target key end

     0   :  { %7 = vsyncpa [#allocation6], 0  ;;  %s714_s0 = inlined_call_operand.vmem [shape: s32[2,8,1], index: 0, kind: input, shape index: {}]   ;;  %s715_s1 = inlined_call_operand.vmem [shape: f32[2,10,32], index: 1, kind: input, shape index: {}]   ;;  %s716_s2 = inlined_call_operand.hbm [shape: f32[2,1,8,128], index: 2, kind: output, shape index: {}]  }
   0x1   :  { %9 = vsyncpa [#allocation6 + $0x1], 0  ;;  %s603_s9 = smov 0   ;;  %s605_s10 = smov 0  }
   0x2   :  { %s607_s11 = smov 0   ;;  %s609_s12 = smov 0  }
   0x3   :  { %s611_s13 = smov 0   ;;  %s613_s14 = smov 0  }
   0x4 LB: > { %s420_s15 = sadd.s32 4294967295, %s583_s14   ;;  %s421_s16 = sadd.s32 4294967294, %s583_s14   ;;  %s583_s14 = sphi %s613_s14, %s15_s14   ;;  %s579_s13 = sphi %s611_s13, %s723_s13   ;;  %s575_s12 = sphi %s609_s12, %s722_s12   ;;  %s571_s11 = sphi %s607_s11, %s721_s11   ;;  %s567_s10 = sphi %s605_s10, %s720_s10   ;;  %s563_s9 = sphi %s603_s9, %s719_s9  }
   0x5   : > { %s34_s17 = sadd.s32 1, %s579_s13  ;;  %s101_s18 = sadd.s32 1, %s571_s11 }
   0x6   : > { %p36_p0 = scmp.ge.s32.totalorder %s34_s17, 2  ;;  %p111_p1 = scmp.ne.s32.totalorder %s571_s11, %s567_s10 }
   0x7   : > { %p112_p2 = scmp.eq.s32.totalorder %s420_s15, 1  ;;  %p117_p3 = scmp.ne.s32.totalorder %s567_s10, %s563_s9 }
   0x8   : > { %s725_s17 = smov (%p36_p0, %s34_s17), 0  ;;  %p118_p5 = scmp.eq.s32.totalorder %s421_s16, 1 }
   0x9   : > { %p643_p4 = por %p112_p2, %p111_p1  ;;  %s96_s20 = ssub.s32 %s579_s13, %s725_s17 }
   0xa   : > { %p424_p6 = scmp.ge.s32.totalorder %s583_s14, 1  ;;  %p99_p7 = scmp.eq.s32.totalorder %s96_s20, 0 }
   0xb   : > { %p650_p8 = por %p118_p5, %p117_p3  ;;  %p160_p9 = scmp.lt.s32.totalorder %s583_s14, 3 }
   0xc   : > { %s656_s22 = scalar_select %p99_p7, %s571_s11, %s101_s18  }
   0xd   : > { %p161_p10 = pnand %p424_p6, %p160_p9 }
   0xe   : > { %p195_p11 = scmp.lt.s32.totalorder (!%p161_p10), %s575_s12, 1  ;;  %s192_s4 = sand.u32 (!%p161_p10), 1, %s567_s10  }
   0xf   : > { %164 = sbr.rel (%p161_p10) target bundleno = 604 (0x25c), region = 28  ;;  %s425_s5 = sshll.u32 (!%p161_p10), %s192_s4, 3 }
  0x10   : > { %s431_s6 = sshll.u32 (!%p161_p10), %s575_s12, 3  ;;  %s194_s16 = scalar_lea.vmem (!%p161_p10), [#allocation5], %s425_s5 }
  0x11   : > { %s320_s15 = scalar_lea.hbm (!%p161_p10), %s716_s2, %s431_s6  ;;  %s322_s18 = sshll.u32 (!%p161_p10), %s194_s16, 4  ;;  %s323_s18 = int_to_ptr.vmem [resolvable:$true] %s322_s18 }
  0x12   : > { %s525_s29 = scalar_lea.hbm (!%p161_p10), %s716_s2, 16 }
  0x14   : > { %vm217_vm0 = vcmask 7168   ;;  %v585_v0 = vmov -inf   ;;  %s196_s23 = scalar_select %p195_p11, %s575_s12, 1  ;;  %vm229_vm1 = vcmask 261120   ;;  %v586_v3 = vmov 0  }
  0x15   : > { %218 = vst.msk [vmem:[#allocation2] sm:$0xff] %vm217_vm0, %v585_v0  ;;  %497 = vset.pattern.permute.xlu0 %v586_v3  ;;  %498 = vset.pattern.permute.xlu1 %v586_v3  ;;  %v587_v4 = vmov 0.0   ;;  %v224_v10 = vlaneseq  ;;  %s309_s12 = scalar_lea.sflag [#allocation6], %s192_s4 }
  0x16   : > { %s434_s24 = sshll.u32 %s196_s23, 4  ;;  %s426_s28 = sshll.u32 %s196_s23, 3  ;;  %219 = vst.msk [vmem:[#allocation3] sm:$0xff] %vm217_vm0, %v587_v4 }
  0x17   : > { %s212_s27 = scalar_lea.vmem %s715_s1, %s434_s24  ;;  %s201_s3 = scalar_lea.vmem %s714_s0, %s426_s28  ;;  %220 = vst.msk [vmem:[#allocation4] sm:$0xff] %vm217_vm0, %v587_v4  ;;  %v225_v12 = vand.u32 127, %v224_v10  ;;  %v300_v54 = vshrl.u32 %v224_v10, 7 }
  0x18   : > { %v221_v1 = vld [vmem:[%s212_s27] sm:$0xff]  ;;  %s324_s23 = sshll.u32 %s320_s15, 4  ;;  %s325_s23 = int_to_ptr.hbm [resolvable:$true] %s324_s23 }
  0x19   : > { %v230_v2 = vsel %vm229_vm1, %v221_v1, -inf  ;;  %v222_v5 = vld [vmem:[%s201_s3] sm:$0xff]  ;;  %vm302_vm4 = vcmp.eq.s32.totalorder %v300_v54, 1  ;;  %vm301_vm5 = vcmp.eq.s32.totalorder %v300_v54, 0  ;;  %s519_s25 = sshra.s32 %s325_s23, 4  ;;  %s520_s25 = int_to_ptr.hbm [resolvable:$true] %s519_s25 }
  0x1a   : > { %231 = vmax.xlane.f32.xlu0 %v230_v2  ;;  %255 = vperm.xlu1 %498, %v222_v5   ;;  %vm273_vm3 = vcmp.ne.s32.totalorder %v222_v5, 0  ;;  %s521_s26 = scalar_lea.hbm %s520_s25, 8  ;;  %p526_p1 = scmp.lt.s32.totalorder %s520_s25, %s716_s2 }
  0x1b   : > { %v429_v38 = vsel %vm273_vm3, 1.0, %v587_v4  ;;  %p522_p12 = scmp.ne.s32.totalorder %s520_s25, %s521_s26  ;;  %p527_p2 = scmp.lt.s32.totalorder %s525_s29, %s521_s26 }
  0x1c   : > { %v228_v6 = vld [vmem:[#allocation2] sm:$0xff]  ;;  %v289_v39 = vsel %vm217_vm0, %v429_v38, 0.0 }
  0x1d   : > { %v245_v25 = vld [vmem:[#allocation3] sm:$0xff]  ;;  %p523_p13 = pnand %p522_p12, %p643_p4  ;;  %p528_p3 = por %p527_p2, %p526_p1 }
  0x1e   : > { %v253_v20 = vld [vmem:[#allocation4] sm:$0xff] }
  0x1f   : > { %p524_p0 = pneg %p523_p13 }
  0x21   : > { %p529_p5 = pnand %p528_p3, %p524_p0 }
  0x8c   : > { %v256_v11 = vpop.permute.xlu1 %255 }
  0x8d   : > { %v232_v7 = vpop.xlane.xlu0 %231  ;;  %vm257_vm2 = vcmp.eq.s32.totalorder %v225_v12, %v256_v11 }
  0x8e   : > { %v233_v8 = vmax.f32 %v228_v6, %v232_v7  ;;  %v258_v13 = vsel %vm257_vm2, %v221_v1, 0.0 }
  0x8f   : > { %v259_v14 = vsel %vm229_vm1, %v258_v13, 0.0 }
  0x90   : > { %v234_v9 = vsub.f32 %v228_v6, %v233_v8  ;;  %264 = vst.msk [vmem:[#allocation2] sm:$0xff] %vm217_vm0, %v233_v8  ;;  %239 = vperm.xlu0 %497, %v233_v8   ;;  %260 = vadd.xlane.f32.xlu2 %v259_v14 }
  0x92   : > { %v235_v23 = vmul.f32 1.442695, %v234_v9 }
  0x97   : > { %v268_v32 = vld [vmem:[#allocation2] sm:$0xff] }
 0x102   : > { %v240_v15 = vpop.permute.xlu0 %239 }
 0x103   : > { %v242_v16 = vsub.f32 %v221_v1, %v240_v15  ;;  %v261_v21 = vpop.xlane.xlu2 %260 }
 0x104   : > { %v262_v22 = vadd.f32 %v261_v21, %v253_v20 }
 0x105   : > { %v243_v17 = vmul.f32 1.442695, %v242_v16 }
 0x106   : > { %263 = vst.msk [vmem:[#allocation4] sm:$0xff] %vm217_vm0, %v262_v22 }
 0x107   : > { %499 = vpow2.f32 %v243_v17 }
 0x108   : > { %501 = vpow2.f32 %v235_v23 }
 0x10d   : > { %v500_v18 = vpop.eup %499  ;;  %v274_v33 = vld [vmem:[#allocation4] sm:$0xff] }
 0x10e   : > { %v247_v19 = vsel %vm229_vm1, %v500_v18, 0.0  ;;  %v502_v24 = vpop.eup %501 }
 0x10f   : > { %248 = vadd.xlane.f32.xlu1 %v247_v19  ;;  %v246_v26 = vmul.f32 %v502_v24, %v245_v25 }
 0x182   : > { %v249_v27 = vpop.xlane.xlu1 %248 }
 0x183   : > { %v250_v28 = vadd.f32 %v249_v27, %v246_v26 }
 0x185   : > { %252 = vst.msk [vmem:[#allocation3] sm:$0xff] %vm217_vm0, %v250_v28 }
 0x18c   : > { %v269_v29 = vld [vmem:[#allocation3] sm:$0xff] }
 0x18d   : > { %503 = vlog2.f32 %v269_v29 }
 0x193   : > { %v504_v30 = vpop.eup %503 }
 0x194   : > { %v271_v31 = vmul.f32 0.6931472, %v504_v30 }
 0x196   : > { %v272_v34 = vadd.f32 %v271_v31, %v268_v32 }
 0x198   : > { %v275_v35 = vsub.f32 %v272_v34, %v274_v33 }
 0x19a   : > { %v276_v36 = vsel %vm273_vm3, %v275_v35, 0.0 }
 0x19b   : > { %v277_v37 = vsel %vm217_vm0, %v276_v36, 0.0 }
 0x19c   : > { %278 = vadd.xlane.f32.xlu2 %v277_v37 }
 0x1a4   : > { %290 = vadd.xlane.f32.xlu2 %v289_v39 }
 0x20f   : > { %v279_v40 = vpop.xlane.xlu2 %278 }
 0x210   : > { %v280_v41 = vrot.slane %v279_v40, 4 }
 0x212   : > { %v281_v42 = vadd.f32 %v280_v41, %v279_v40 }
 0x214   : > { %v282_v43 = vrot.slane %v281_v42, 2 }
 0x216   : > { %v283_v44 = vadd.f32 %v282_v43, %v281_v42 }
 0x217   : > { %v291_v45 = vpop.xlane.xlu2 %290 }
 0x218   : > { %v292_v46 = vrot.slane %v291_v45, 4  ;;  %v284_v47 = vrot.slane %v283_v44, 1 }
 0x21a   : > { %v293_v48 = vadd.f32 %v292_v46, %v291_v45  ;;  %v285_v49 = vadd.f32 %v284_v47, %v283_v44 }
 0x21c   : > { %v294_v50 = vrot.slane %v293_v48, 2  ;;  %435 = vpush %v285_v49 }
 0x21e   : > { %v295_v51 = vadd.f32 %v294_v50, %v293_v48 }
 0x220   : > { %v296_v52 = vrot.slane %v295_v51, 1 }
 0x222   : > { %v297_v53 = vadd.f32 %v296_v52, %v295_v51 }
 0x224   : > { %437 = vpush %v297_v53 }
 0x24d   : > { %s436_s20 = spop %435 }
 0x24e   : > { %v305_v56 = vstv %s436_s20 }
 0x255   : > { %s438_s24 = spop %437 }
 0x256   : > { %v303_v55 = vstv %s438_s24 }
 0x257   : > { %v304_v57 = vsel %vm302_vm4, %v303_v55, 0.0 }
 0x258   : > { %v306_v58 = vsel %vm301_vm5, %v305_v56, %v304_v57 }
 0x259   : > { %307 = vst [vmem:[%s194_s16] sm:$0xff] %v306_v58 }
 0x25a   : > { %532 = shalt.err (!%p529_p5)
}
 0x25b   : > { %439 = dma.vmem_to_hbm [thread:$0]  (%p643_p4), %s323_s18, 128, %s325_s23, %s309_s12  }
 0x25c PF: > { %p445_p6 = scmp.ge.s32.totalorder %s583_s14, 2  ;;  %s336_s4 = sand.u32 1, %s563_s9  }
 0x25d   : > { %s337_s5 = scalar_lea.sflag [#allocation6], %s336_s4 }
 0x25e   : > { %p442_p7 = pnand %p445_p6, %p650_p8 }
 0x260   : > { %p443_p9 = pneg %p442_p7 }
 0x262   : > { %558 = dma.done.wait (%p443_p9), %s337_s5, 128  }
 0x263   : > { %560 = vsyncadd (%p443_p9), %s337_s5, 4294967168  ;;  %s15_s14 = sadd.s32 1, %s583_s14   ;;  %s719_s9 = smov %s567_s10 }
 0x264   : > { %p12_p10 = scmp.ge.s32.totalorder %s15_s14, 4   ;;  %s720_s10 = smov %s571_s11 }
 0x265   : > { %s721_s11 = smov %s656_s22  ;;  %s722_s12 = smov %s579_s13 }
 0x266   : > { %s723_s13 = smov %s725_s17  ;;  %14 = sbr.rel (!%p12_p10) target bundleno = 4 (0x4), region = 74 }
 0x26b   :  { %343 = vsyncpa [#allocation6], 1 }
 0x26c   :  { %345 = vsyncpa [#allocation6 + $0x1], 1 }

</bundles_post_ra>
